<compile_context>
chip_gen: v5e
topology: v5e:2x2
jax: 0.10.0
libtpu: 0.0.40
codegen_flags: <defaults>
</compile_context>

<pallas_src>
import functools

import jax
import jax.numpy as jnp
from jax.experimental import pallas as pl
from jax.experimental.pallas import tpu as pltpu

LANE = 128           # lane width of the flattened slab (fast axis)
ROW_TILE = 8         # sublane tile
BLOCK_ROWS = 8192    # rows per block in the tiled path -> 4 MiB f32 per block


# --------------------------------------------------------------------------------------
# Hardware-dependent sizing (queried once; safe fallbacks if the query fails).
# --------------------------------------------------------------------------------------
@functools.lru_cache(maxsize=1)
def _tpu_config():
    vmem_cap = 64 * 1024 * 1024             # conservative default (v7x per-core VMEM)
    try:
        info = pltpu.get_tpu_info()
        vmem_cap = int(getattr(info, "vmem_capacity_bytes", vmem_cap))
    except Exception:
        pass
    multicore = False
    try:
        # v7x has 2 TensorCores per chip; a grid-less fused call uses only one of them.
        multicore = "v7" in jax.devices()[0].device_kind.lower()
    except Exception:
        pass
    vmem_limit = (vmem_cap // 8) * 7        # leave 1/8 headroom for compiler scratch
    vmem_limit = max(32 * 1024 * 1024, min(vmem_limit, 112 * 1024 * 1024))
    # Fused path keeps input slab + f32 working copies + output slab resident at once.
    fused_budget = vmem_limit // 2 if multicore else vmem_limit
    return vmem_limit, fused_budget


# --------------------------------------------------------------------------------------
# Kernels
# --------------------------------------------------------------------------------------
def _fused_kernel(lr_ref, x_ref, o_ref):
    """Single pass: whole slab resident in VMEM; 1 HBM read + 1 HBM write.
    NOTE: matches PyTorch `x / x.norm()` -- an all-zero tensor yields inf/nan, by design."""
    x = x_ref[...].astype(jnp.float32)
    sumsq = jnp.sum(x * x)
    scale = lr_ref[0] / jnp.sqrt(sumsq)        # scalar; sqrt for bit-closeness to ref
    o_ref[...] = (x * scale).astype(o_ref.dtype)


def _partial_sumsq_kernel(x_ref, partial_ref, *, block_rows, nrows):
    """Pass 1 (tiled): per-block partial sum of squares, reduced only to an (8,128)
    vreg-shaped tile (cheap VPU adds); the final scalar reduce happens in the wrapper."""
    x = x_ref[...].astype(jnp.float32)
    if nrows % block_rows != 0:
        # Last block is partial: rows beyond the array hold unspecified VMEM data --
        # zero them so they do not pollute the reduction (hidden under DMA).
        row = (pl.program_id(0) * block_rows
               + jax.lax.broadcasted_iota(jnp.int32, x.shape, 0))
        x = jnp.where(row < nrows, x, 0.0)
    xsq = x * x
    partial_ref[0] = jnp.sum(xsq.reshape(-1, ROW_TILE, LANE), axis=0)


def _scale_kernel(scale_ref, x_ref, o_ref):
    """Pass 2 (tiled): out = x * scale with a precomputed SMEM scalar.  Out-of-bounds
    rows of a partial last block are computed on garbage but clipped on writeback."""
    o_ref[...] = (x_ref[...].astype(jnp.float32) * scale_ref[0]).astype(o_ref.dtype)


# --------------------------------------------------------------------------------------
# pallas_call wrappers
# --------------------------------------------------------------------------------------
def _fused_call(x_slab, lr_arr, out_dtype, vmem_limit):
    # TODO(synk): on v7x a 2-block ("parallel",) fused variant could use both cores'
    #             DMA engines; for now the v7x fused budget is simply kept low.
    return pl.pallas_call(
        _fused_kernel,
        out_shape=jax.ShapeDtypeStruct(x_slab.shape, out_dtype),
        in_specs=[pl.BlockSpec(memory_space=pltpu.MemorySpace.SMEM),
                  pl.BlockSpec(memory_space=pltpu.MemorySpace.VMEM)],
        out_specs=pl.BlockSpec(memory_space=pltpu.MemorySpace.VMEM),
        compiler_params=pltpu.CompilerParams(vmem_limit_bytes=vmem_limit),
    )(lr_arr, x_slab)


def _tiled_call(x2d, lr_arr, out_dtype, nrows, block_rows, vmem_limit):
    nrows_up = pl.cdiv(nrows, ROW_TILE) * ROW_TILE
    block_rows = max(ROW_TILE, (min(block_rows, nrows_up) // ROW_TILE) * ROW_TILE)
    num_blocks = pl.cdiv(nrows, block_rows)

    # Pass 1: per-block partial sums ("parallel" grid keeps both TCs busy on v7x).
    partials = pl.pallas_call(
        functools.partial(_partial_sumsq_kernel,
                          block_rows=block_rows, nrows=nrows),
        out_shape=jax.ShapeDtypeStruct((num_blocks, ROW_TILE, LANE), jnp.float32),
        grid=(num_blocks,),
        in_specs=[pl.BlockSpec((block_rows, LANE), lambda i: (i, 0))],
        out_specs=pl.BlockSpec((1, ROW_TILE, LANE), lambda i: (i, 0, 0)),
        compiler_params=pltpu.CompilerParams(
            dimension_semantics=("parallel",),
            vmem_limit_bytes=vmem_limit),
    )(x2d)

    # Tiny combine + scale precompute (partials are ~input_bytes/4096 -> negligible).
    sumsq = jnp.sum(partials, dtype=jnp.float32)
    scale = (lr_arr / jnp.sqrt(sumsq)).astype(jnp.float32)   # shape (1,)

    # Pass 2: one vector multiply per element, scalar scale passed via SMEM.
    return pl.pallas_call(
        _scale_kernel,
        out_shape=jax.ShapeDtypeStruct(x2d.shape, out_dtype),
        grid=(num_blocks,),
        in_specs=[pl.BlockSpec(memory_space=pltpu.MemorySpace.SMEM),
                  pl.BlockSpec((block_rows, LANE), lambda i: (i, 0))],
        out_specs=pl.BlockSpec((block_rows, LANE), lambda i: (i, 0)),
        compiler_params=pltpu.CompilerParams(
            dimension_semantics=("parallel",),
            vmem_limit_bytes=vmem_limit),
    )(scale, x2d)


# --------------------------------------------------------------------------------------
# Public wrapper
# --------------------------------------------------------------------------------------
def plasticity_norm(plasticity, lr, *, use_fused=None, block_rows=BLOCK_ROWS):
    """out = lr * plasticity / ||plasticity||_2 (global L2 norm over all elements)."""
    orig_shape = plasticity.shape
    orig_dtype = plasticity.dtype
    n = plasticity.size

    vmem_limit, fused_budget = _tpu_config()
    lr_arr = jnp.asarray(lr, dtype=jnp.float32).reshape(1)

    itemsize = jnp.dtype(orig_dtype).itemsize
    # Fused working set per element: input slab + output slab + two f32 temporaries.
    fused_bytes = n * (2 * itemsize + 8)

    aligned = (n % LANE == 0)

    if use_fused is None:
        # Ragged tensors go through a 1-D slab that may be sublane-padded in VMEM,
        # so be conservative with their fused budget.
        budget = fused_budget if aligned else fused_budget // 8
        use_fused = fused_bytes <= budget

    if aligned:
        nrows = n // LANE
        x2d = plasticity.reshape(nrows, LANE)          # zero-copy, lane-dense slab
        if use_fused:
            out2d = _fused_call(x2d, lr_arr, orig_dtype, vmem_limit)
        else:
            out2d = _tiled_call(x2d, lr_arr, orig_dtype, nrows, block_rows, vmem_limit)
        return out2d.reshape(orig_shape)

    # Ragged element count (n % 128 != 0).
    flat = plasticity.reshape(-1)                      # zero-copy
    if use_fused:
        out_flat = _fused_call(flat, lr_arr, orig_dtype, vmem_limit)
        return out_flat.reshape(orig_shape)

    # Large ragged tensors: pad up to a full (8,128) tile; zero padding does not change
    # the sum of squares.
    # TODO(synk): mask the ragged tail inside the tiled kernels instead of materializing
    #             this padded copy (+2N HBM bytes) and the output slice.
    nrows = pl.cdiv(pl.cdiv(n, LANE), ROW_TILE) * ROW_TILE
    x2d = jnp.pad(flat, (0, nrows * LANE - n)).reshape(nrows, LANE)
    out2d = _tiled_call(x2d, lr_arr, orig_dtype, nrows, block_rows, vmem_limit)
    return out2d.reshape(-1)[:n].reshape(orig_shape)


# --------------------------------------------------------------------------------------
if __name__ == "__main__":
    lr = 0.01
    key = jax.random.PRNGKey(0)

    def reference(x):
        return lr * x / jnp.sqrt(jnp.sum(x * x))

    k0, k1, k2 = jax.random.split(key, 3)

    # 1) Demo tensor from the module (NCHW plasticity) -> fused single-pass path.
    x0 = jax.random.normal(k0, (2, 4, 16, 16), dtype=jnp.float32)
    out0 = jax.block_until_ready(plasticity_norm(x0, lr))
    assert out0.shape == x0.shape and out0.dtype == x0.dtype
    assert jnp.allclose(out0, reference(x0), rtol=2e-5, atol=1e-6), "fused path mismatch"

    # 2) Forced tiled 2-pass path with default (large) blocks (single clamped block).
    x1 = jax.random.normal(k1, (2, 4, 160, 128), dtype=jnp.float32)
    out1 = jax.block_until_ready(plasticity_norm(x1, lr, use_fused=False))
    assert jnp.allclose(out1, reference(x1), rtol=2e-5, atol=1e-6), "tiled path mismatch"

    # 3) Tiled path with small blocks -> multiple blocks incl. a masked partial edge block.
    out1b = jax.block_until_ready(
        plasticity_norm(x1, lr, use_fused=False, block_rows=512))
    assert jnp.allclose(out1b, reference(x1), rtol=2e-5, atol=1e-6), "edge-block mismatch"

    # 4) Ragged element count (not a multiple of 128) -> fused flat path, no padding copy.
    x2 = jax.random.normal(k2, (3, 5, 7, 11), dtype=jnp.float32)
    out2 = jax.block_until_ready(plasticity_norm(x2, lr))
    assert out2.shape == x2.shape
    assert jnp.allclose(out2, reference(x2), rtol=2e-5, atol=1e-6), "ragged fused mismatch"

    # 5) Ragged + forced tiled -> padded fallback path.
    out2b = jax.block_until_ready(plasticity_norm(x2, lr, use_fused=False))
    assert jnp.allclose(out2b, reference(x2), rtol=2e-5, atol=1e-6), "ragged tiled mismatch"

    print("KERNEL_OK")
</pallas_src>

<mosaic_0001>
module attributes {stable_mosaic.version = 11 : i64} {
  func.func @_fused_kernel(%arg0: memref<1xf32, #tpu.memory_space<smem>>, %arg1: memref<16x128xf32, #tpu.memory_space<vmem>>, %arg2: memref<16x128xf32, #tpu.memory_space<vmem>>) attributes {dimension_semantics = [], scalar_prefetch = 0 : i64, scratch_operands = 0 : i64, tpu.core_type = #tpu.core_type<tc>} {
    %c0 = arith.constant 0 : index
    %c0_0 = arith.constant 0 : index
    %0 = vector.load %arg1[%c0, %c0_0] : memref<16x128xf32, #tpu.memory_space<vmem>>, vector<16x128xf32>
    %1 = arith.mulf %0, %0 : vector<16x128xf32>
    %2 = vector.shape_cast %1 : vector<16x128xf32> to vector<1x16x128xf32>
    %cst = arith.constant dense<0.000000e+00> : vector<1xf32>
    %3 = vector.multi_reduction <add>, %2, %cst [1, 2] : vector<1x16x128xf32> to vector<1xf32>
    %4 = vector.shape_cast %3 : vector<1xf32> to vector<1x1x1xf32>
    %5 = vector.extract %4[0, 0, 0] : f32 from vector<1x1x1xf32>
    %c0_1 = arith.constant 0 : index
    %6 = memref.load %arg0[%c0_1] : memref<1xf32, #tpu.memory_space<smem>>
    %7 = math.sqrt %5 : f32
    %8 = arith.divf %6, %7 : f32
    %9 = vector.broadcast %8 : f32 to vector<16x128xf32>
    %10 = arith.mulf %0, %9 : vector<16x128xf32>
    %c0_2 = arith.constant 0 : index
    %c0_3 = arith.constant 0 : index
    %11 = vector.load %arg2[%c0_2, %c0_3] : memref<16x128xf32, #tpu.memory_space<vmem>>, vector<16x128xf32>
    tpu.vector_store %arg2[%c0_2, %c0_3], %10 {strides = array<i32>} : memref<16x128xf32, #tpu.memory_space<vmem>>, vector<16x128xf32>,
    return
  }
}

</mosaic_0001>

<bundles_post_ra>
// kernel: tpu_custom_call.1
= control target key start
LH: loop header
LB: loop body
LE: loop exit
PB: predicated region body
PF: predicated region fallthrough
CT: control target
= control target key end

     0   :  { %8 = vsyncpa [#allocation4], 0  ;;  %s199_s0 = inlined_call_operand.<no memory space> [shape: f32[1], index: 0, kind: input, shape index: {}]   ;;  %s200_s1 = inlined_call_operand.hbm [shape: f32[16,128], index: 1, kind: input, shape index: {}]   ;;  %s201_s2 = inlined_call_operand.hbm [shape: f32[16,128], index: 2, kind: output, shape index: {}]  }
   0x1   :  { %9 = vsyncpa [#allocation5], 0  ;;  %s16_s11 = sshll.u32 %s200_s1, 4  ;;  %s165_s12 = smov [#allocation3]   ;;  %s17_s11 = int_to_ptr.hbm [resolvable:$true] %s16_s11 }
   0x2   :  { %s18_s13 = sshll.u32 %s165_s12, 4  ;;  %s166_s14 = smov 128   ;;  %s19_s13 = int_to_ptr.vmem [resolvable:$true] %s18_s13 }
   0x3   :  { %s167_s15 = smov 8  }
   0x4   :  { %24 = dma.hbm_to_vmem [thread:$0]  %s17_s11, 256, %s19_s13, [#allocation4], %s166_s14, %s166_s14, %s167_s15  }
   0x5   :  { %161 = dma.done.wait [#allocation4], 256  }
   0x6   :  { %162 = vsyncadd [#allocation4], 4294967040  ;;  %v29_v0 = vld [vmem:[#allocation3] sm:$0xff]  ;;  %v30_v1 = vld [vmem:[#allocation3 + $0x8] sm:$0xff]  ;;  %s168_s21 = smov [#allocation6]   ;;  %s86_s25 = sshll.u32 %s201_s2, 4  ;;  %s87_s25 = int_to_ptr.hbm [resolvable:$true] %s86_s25 }
   0x7   :  { %v31_v2 = vmul.f32 %v29_v0, %v29_v0  ;;  %v32_v3 = vmul.f32 %v30_v1, %v30_v1  ;;  %s84_s22 = sshll.u32 %s168_s21, 4  ;;  %s85_s22 = int_to_ptr.vmem [resolvable:$true] %s84_s22 }
   0x9   :  { %v33_v4 = vadd.f32 %v32_v3, %v31_v2 }
   0xb   :  { %34 = vadd.xlane.f32.xlu0 %v33_v4 }
  0x7e   :  { %v35_v5 = vpop.xlane.xlu0 %34 }
  0x7f   :  { %v36_v6 = vrot.slane %v35_v5, 4 }
  0x81   :  { %v37_v7 = vadd.f32 %v36_v6, %v35_v5 }
  0x83   :  { %v38_v8 = vrot.slane %v37_v7, 2 }
  0x85   :  { %v39_v9 = vadd.f32 %v38_v8, %v37_v7 }
  0x87   :  { %v40_v10 = vrot.slane %v39_v9, 1 }
  0x89   :  { %v41_v11 = vadd.f32 %v40_v10, %v39_v9 }
  0x8b   :  { %99 = vpush %v41_v11 }
  0xbc   :  { %s100_s1 = spop %99 }
  0xbd   :  { %v44_v12 = vstv %s100_s1 }
  0xbe   :  { %109 = vrsqrt.f32 %v44_v12  ;;  %vm52_vm0 = vcmp.eq.f32.partialorder %v44_v12, inf  ;;  %v55_v20 = vand.u32 2147483648, %v44_v12  ;;  %vm54_vm1 = vcmp.eq.f32.partialorder %v44_v12, 0.0 }
  0xc4   :  { %v110_v13 = vpop.eup %109 }
  0xc5   :  { %v46_v14 = vmul.f32 %v110_v13, %v44_v12 }
  0xc7   :  { %v47_v15 = vmul.f32 %v110_v13, %v46_v14 }
  0xc9   :  { %v48_v16 = vmul.f32 0.5, %v47_v15 }
  0xcb   :  { %v49_v17 = vsub.f32 1.5, %v48_v16 }
  0xcd   :  { %v50_v18 = vmul.f32 %v110_v13, %v49_v17 }
  0xcf   :  { %v51_v19 = vmul.f32 %v50_v18, %v44_v12 }
  0xd1   :  { %v53_v21 = vsel %vm52_vm0, %v44_v12, %v51_v19 }
  0xd2   :  { %v56_v22 = vsel %vm54_vm1, %v55_v20, %v53_v21 }
  0xd3   :  { %101 = vpush %v56_v22 }
 0x104   :  { %s102_s16 = spop %101 }
 0x105   :  { %v58_v23 = vstv %s102_s16 }
 0x106   :  { %111 = vrcp.f32 %v58_v23  ;;  %v70_v27 = vand.u32 2147483648, %v58_v23  ;;  %v68_v29 = vand.u32 2147483647, %v58_v23  ;;  %vm64_vm3 = vweird.f32 %v58_v23 }
 0x108   :  { %v71_v31 = vor.u32 1.1754944e-38, %v70_v27  ;;  %vm69_vm5 = vcmp.eq.f32.partialorder %v68_v29, 8.507059e+37 }
 0x10c   :  { %v112_v24 = vpop.eup %111 }
 0x10d   :  { %v60_v25 = vmul.f32 %v112_v24, %v58_v23  ;;  %vm65_vm2 = vweird.f32 %v112_v24 }
 0x10e   :  { %vm66_vm4 = vmor %vm64_vm3, %vm65_vm2 }
 0x10f   :  { %v61_v26 = vsub.f32 1.0, %v60_v25 }
 0x111   :  { %v62_v28 = vmul.f32 %v112_v24, %v61_v26 }
 0x113   :  { %v63_v30 = vadd.f32 %v112_v24, %v62_v28 }
 0x115   :  { %v67_v32 = vsel %vm66_vm4, %v112_v24, %v63_v30 }
 0x116   :  { %v72_v33 = vsel %vm69_vm5, %v71_v31, %v67_v32 }
 0x117   :  { %103 = vpush %v72_v33 }
 0x148   :  { %s104_s17 = spop %103 }
 0x149   :  { %s74_s20 = smul.f32 %s104_s17, %s199_s0 }
 0x14b   :  { %v75_v34 = vstv %s74_s20 }
 0x14c   :  { %v76_v35 = vmul.f32 %v75_v34, %v29_v0  ;;  %v77_v36 = vmul.f32 %v75_v34, %v30_v1 }
 0x14e   :  { %78 = vst [vmem:[#allocation6] sm:$0xff] %v76_v35 }
 0x14f   :  { %79 = vst [vmem:[#allocation6 + $0x8] sm:$0xff] %v77_v36 }
 0x150   :  { %92 = dma.vmem_to_hbm [thread:$0]  %s85_s22, 256, %s87_s25, [#allocation5], %s166_s14, %s166_s14, %s167_s15  }
 0x151   :  { %163 = dma.done.wait [#allocation5], 256  }
 0x152   :  { %164 = vsyncadd [#allocation5], 4294967040 }
 0x153   :  { %97 = vsyncpa [#allocation4], 1 }
 0x154   :  { %98 = vsyncpa [#allocation5], 1 }

</bundles_post_ra>
